<compile_context>
chip_gen: v7x
topology: tpu7x:2x2x1
jax: 0.10.0
libtpu: 0.0.40
codegen_flags: <defaults>
</compile_context>

<pallas_src>
import functools

import jax
import jax.numpy as jnp
from jax.experimental import pallas as pl
from jax.experimental.pallas import tpu as pltpu

_LANES = 128
_BLOCK_ROWS_CAP = 8192            # 8192 x 128 x 4 B = 4 MiB per block
_MIN_GRID_STEPS = 4               # >= 4 steps when possible (v7x: 2 TCs x >= 2)
_VMEM_LIMIT = 32 * 1024 * 1024    # 4 live blocks x 4 MiB = 16 MiB; 2x headroom

_APPROX_FLOPS_PER_ELEM = {"cartesian": 2, "real": 2, "modulus": 8, "cardioid": 9}


def _round_up(a, b):
    return -(-a // b) * b


def _leaky_relu(x, negative_slope):
    # nn.LeakyReLU: x if x >= 0 else negative_slope * x
    return jnp.where(x >= 0, x, negative_slope * x)


def _make_kernel(mode, negative_slope, bias):
    neg = float(negative_slope)
    b = float(bias)

    def kernel(x_ref, o_ref):
        x = x_ref[...]                    # (block_rows, 128); lanes = re,im,re,im,...
        if mode == "cartesian":
            o_ref[...] = _leaky_relu(x, neg)
            return

        lane = jax.lax.broadcasted_iota(jnp.int32, x.shape, 1)
        is_re = (lane & 1) == 0

        if mode == "real":
            o_ref[...] = jnp.where(is_re, _leaky_relu(x, neg), x)
            return

        # modulus / cardioid: each lane needs its pair partner (the re<->im
        # value in the adjacent lane).  XLU rolls are free under HBM; the
        # select below is correct under either pltpu.roll sign convention.
        n = x.shape[-1]                   # 128 (even: pairs never split)
        x_fwd = pltpu.roll(x, 1, axis=1)
        x_bwd = pltpu.roll(x, n - 1, axis=1)
        lane_fwd = pltpu.roll(lane, 1, axis=1)
        partner = jnp.where(lane_fwd == (lane ^ 1), x_fwd, x_bwd)

        modsq = x * x + partner * partner
        inv_abs = jax.lax.rsqrt(modsq)    # EUP; inf at z == 0 (gated below)

        if mode == "modulus":
            # (|z| + b)/|z| = 1 + b/|z|.  Static b turns the PyTorch gate
            # (|z| + b > 0) into a compare on modsq -> no jnp.sqrt needed.
            s = 1.0 + b * inv_abs
            thresh = 0.0 if b >= 0.0 else b * b
            # z == 0 with b > 0: PyTorch propagates NaN (0/0); we return 0.
            o_ref[...] = jnp.where(modsq > thresh, s * x, 0.0)
        elif mode == "cardioid":
            re_val = jnp.where(is_re, x, partner)
            s = 0.5 * (1.0 + re_val * inv_abs)        # cos(angle(z)) = re/|z|
            o_ref[...] = jnp.where(modsq > 0.0, s * x, 0.0)   # angle(0)=0 -> 0
        else:
            raise NotImplementedError(mode)

    return kernel


def _pick_block_rows(rows):
    if rows < 8 * _MIN_GRID_STEPS:
        return rows                        # tiny slab: one full-extent block
    br = min(_BLOCK_ROWS_CAP, _round_up(-(-rows // _MIN_GRID_STEPS), 8))
    # Prefer a nearby block size that divides rows evenly (unmasked, balanced
    # final step; evens out the v7x two-core split).  Bounded search only.
    for cand in range(br, max(8, br - 256) - 1, -8):
        if rows % cand == 0:
            return cand
    return br


def _run_pallas(x2, mode, negative_slope, bias, alias_input):
    rows = x2.shape[0]
    block_rows = _pick_block_rows(rows)
    grid = (pl.cdiv(rows, block_rows),)
    spec = pl.BlockSpec((block_rows, _LANES), lambda i: (i, 0))
    n_el = rows * _LANES
    cost = pl.CostEstimate(
        flops=_APPROX_FLOPS_PER_ELEM[mode] * n_el,
        transcendentals=n_el if mode in ("modulus", "cardioid") else 0,
        bytes_accessed=2 * n_el * 4)
    return pl.pallas_call(
        _make_kernel(mode, negative_slope, bias),
        out_shape=jax.ShapeDtypeStruct((rows, _LANES), jnp.float32),
        grid=grid,
        in_specs=[spec],
        out_specs=spec,
        input_output_aliases={0: 0} if alias_input else {},
        compiler_params=pltpu.CompilerParams(
            dimension_semantics=("parallel",),
            vmem_limit_bytes=_VMEM_LIMIT),
        cost_estimate=cost,
    )(x2)


def _pairs_jnp(p, mode, negative_slope, bias):
    """Pure-JAX path for the ragged tail (< 64 complex elems).  p: (m, 2) f32."""
    re, im = p[:, 0], p[:, 1]
    if mode == "cartesian":
        return jnp.stack([_leaky_relu(re, negative_slope),
                          _leaky_relu(im, negative_slope)], axis=-1)
    if mode == "real":
        return jnp.stack([_leaky_relu(re, negative_slope), im], axis=-1)
    modsq = re * re + im * im
    inv_abs = jax.lax.rsqrt(modsq)
    if mode == "modulus":
        thresh = 0.0 if bias >= 0.0 else bias * bias
        s = jnp.where(modsq > thresh, 1.0 + bias * inv_abs, 0.0)
    else:  # cardioid
        s = jnp.where(modsq > 0.0, 0.5 * (1.0 + re * inv_abs), 0.0)
    return jnp.stack([s * re, s * im], axis=-1)


_BITCAST_OK = None


def _complex_bitcast_supported():
    """True iff lax.bitcast_convert_type round-trips complex64<->f32 (re first)."""
    global _BITCAST_OK
    if _BITCAST_OK is None:
        try:
            probe = jnp.array([1.0 + 2.0j, 3.0 - 4.0j], jnp.complex64)
            f = jax.device_get(jax.lax.bitcast_convert_type(probe, jnp.float32))
            c = jax.device_get(
                jax.lax.bitcast_convert_type(jnp.asarray(f), jnp.complex64))
            _BITCAST_OK = bool(
                f.shape == (2, 2)
                and f[0, 0] == 1.0 and f[0, 1] == 2.0
                and f[1, 0] == 3.0 and f[1, 1] == -4.0
                and c.shape == (2,) and c[1] == (3.0 - 4.0j))
        except Exception:
            _BITCAST_OK = False
    return _BITCAST_OK


@functools.partial(
    jax.jit, static_argnames=("mode", "negative_slope", "bias", "use_bitcast"))
def _complex_relu_impl(z, *, mode, negative_slope, bias, use_bitcast):
    orig_shape = z.shape
    zf = z.astype(jnp.complex64).reshape(-1)                 # (N,) complex64

    if use_bitcast:
        pairs = jax.lax.bitcast_convert_type(zf, jnp.float32)   # (N, 2) view
    else:
        # TODO(synk): fallback costs one extra fused HBM pass each way.
        pairs = jnp.stack([jnp.real(zf), jnp.imag(zf)], axis=-1).astype(jnp.float32)

    flat = pairs.reshape(-1)                                 # (2N,) re,im interleaved
    n_f32 = flat.shape[0]
    rows = n_f32 // _LANES
    main_n = rows * _LANES
    tail_n = n_f32 - main_n                                  # 0..126, always even

    parts = []
    if rows > 0:
        x2 = flat[:main_n].reshape(rows, _LANES)
        out_main = _run_pallas(x2, mode, negative_slope, bias,
                               alias_input=not use_bitcast)
        parts.append(out_main.reshape(-1))
    if tail_n > 0:
        # Ragged tail: tiny pure-JAX epilogue instead of a whole-array pad
        # concatenate (saves a full extra HBM pass on the big slab).
        tail = flat[main_n:].reshape(-1, 2)
        parts.append(_pairs_jnp(tail, mode, negative_slope, bias).reshape(-1))

    out_flat = parts[0] if len(parts) == 1 else jnp.concatenate(parts)
    out_pairs = out_flat.reshape(-1, 2)
    if use_bitcast:
        out_c = jax.lax.bitcast_convert_type(out_pairs, jnp.complex64)
    else:
        out_c = jax.lax.complex(out_pairs[:, 0], out_pairs[:, 1])
    return out_c.reshape(orig_shape)


def complex_relu(z, *, mode="real", negative_slope=0.0, bias_shape=None, scale=1.0):
    """Pallas TPU implementation of ComplexReLU.forward (complex64 in/out)."""
    if mode not in ("cartesian", "modulus", "cardioid", "real"):
        raise NotImplementedError(mode)
    # PyTorch __init__: bias = scale * ones(bias_shape or (1,)) for 'modulus';
    # at init that is numerically a scalar, so the scalar value is exact here.
    # TODO(synk): a learned per-channel bias (bias_shape) is not wired into the
    # flattened interleaved layout; only the init-value (scalar) bias is used.
    del bias_shape
    bias = float(scale) if mode == "modulus" else 0.0
    return _complex_relu_impl(
        z, mode=mode, negative_slope=float(negative_slope), bias=bias,
        use_bitcast=_complex_bitcast_supported())


def _reference(z, *, mode, negative_slope=0.0, scale=1.0):
    """Pure-JAX reference mirroring the PyTorch forward."""
    re = jnp.real(z).astype(jnp.float32)
    im = jnp.imag(z).astype(jnp.float32)
    act = lambda v: jnp.where(v >= 0, v, negative_slope * v)
    if mode == "cartesian":
        return jax.lax.complex(act(re), act(im))
    if mode == "real":
        return jax.lax.complex(act(re), im)
    zabs = jnp.sqrt(re * re + im * im)
    safe = jnp.maximum(zabs, 1e-30)
    if mode == "modulus":
        b = jnp.float32(scale)
        s = jnp.where(zabs + b > 0, (zabs + b) / safe, 0.0)
        return jax.lax.complex(s * re, s * im)
    if mode == "cardioid":
        s = 0.5 * (1.0 + re / safe)
        return jax.lax.complex(s * re, s * im)
    raise NotImplementedError(mode)


if __name__ == "__main__":
    key = jax.random.PRNGKey(0)
    kr, ki, kr2, ki2 = jax.random.split(key, 4)

    shape = (2, 4, 16, 16)                     # NCHW, small; size % 64 == 0
    z = (jax.random.normal(kr, shape, dtype=jnp.float32)
         + 1j * jax.random.normal(ki, shape, dtype=jnp.float32)).astype(jnp.complex64)

    shape_r = (2, 3, 7, 13)                    # ragged: exercises the tail path
    zr = (jax.random.normal(kr2, shape_r, dtype=jnp.float32)
          + 1j * jax.random.normal(ki2, shape_r, dtype=jnp.float32)).astype(jnp.complex64)

    cases = [
        (z, "real", 0.0, 1.0),
        (z, "cartesian", 0.0, 1.0),
        (z, "cartesian", 0.1, 1.0),
        (z, "modulus", 0.0, 1.0),
        (z, "cardioid", 0.0, 1.0),
        (zr, "cardioid", 0.0, 1.0),
        (zr, "modulus", 0.0, 0.5),
    ]

    ok = True
    for zin, mode, slope, scale in cases:
        out = complex_relu(zin, mode=mode, negative_slope=slope,
                           bias_shape=None, scale=scale)
        out = jax.block_until_ready(out)
        ref = _reference(zin, mode=mode, negative_slope=slope, scale=scale)
        if out.shape != zin.shape or out.dtype != jnp.complex64:
            ok = False
        if not bool(jnp.allclose(out, ref, atol=1e-5, rtol=1e-5)):
            ok = False

    if ok:
        print("KERNEL_OK")
</pallas_src>

<mosaic_0001>
module attributes {stable_mosaic.version = 11 : i64} {
  func.func @kernel(%arg0: i32, %arg1: memref<8x128xf32, #tpu.memory_space<vmem>>, %arg2: memref<8x128xf32, #tpu.memory_space<vmem>>) attributes {dimension_semantics = [#tpu.dimension_semantics<parallel>], iteration_bounds = array<i64: 4>, scalar_prefetch = 0 : i64, scratch_operands = 0 : i64, tpu.core_type = #tpu.core_type<tc>, window_params = [{transform_indices = @transform_0, window_bounds = array<i64: 8, 128>}, {transform_indices = @transform_1, window_bounds = array<i64: 8, 128>}]} {
    %c0 = arith.constant 0 : index
    %c0_0 = arith.constant 0 : index
    %0 = vector.load %arg1[%c0, %c0_0] : memref<8x128xf32, #tpu.memory_space<vmem>>, vector<8x128xf32>
    %1 = tpu.iota {dimensions = array<i32: 1>} : vector<8x128xi32>
    %c1_i32 = arith.constant 1 : i32
    %2 = vector.broadcast %c1_i32 : i32 to vector<8x128xi32>
    %3 = arith.andi %1, %2 : vector<8x128xi32>
    %c0_i32 = arith.constant 0 : i32
    %4 = vector.broadcast %c0_i32 : i32 to vector<8x128xi32>
    %5 = arith.cmpi eq, %3, %4 : vector<8x128xi32>
    %cst = arith.constant 0.000000e+00 : f32
    %6 = vector.broadcast %cst : f32 to vector<8x128xf32>
    %7 = arith.cmpf oge, %0, %6 : vector<8x128xf32>
    %cst_1 = arith.constant 0.000000e+00 : f32
    %8 = vector.broadcast %cst_1 : f32 to vector<8x128xf32>
    %9 = arith.mulf %8, %0 : vector<8x128xf32>
    %10 = arith.select %7, %0, %9 : vector<8x128xi1>, vector<8x128xf32>
    %11 = arith.select %5, %10, %0 : vector<8x128xi1>, vector<8x128xf32>
    %c0_2 = arith.constant 0 : index
    %c0_3 = arith.constant 0 : index
    %12 = vector.load %arg2[%c0_2, %c0_3] : memref<8x128xf32, #tpu.memory_space<vmem>>, vector<8x128xf32>
    tpu.vector_store %arg2[%c0_2, %c0_3], %11 {strides = array<i32>} : memref<8x128xf32, #tpu.memory_space<vmem>>, vector<8x128xf32>,
    return
  }
  func.func @transform_0(%arg0: i32) -> (i32, i32) {
    %c0_i32 = arith.constant 0 : i32
    %c0_i32_0 = arith.constant 0 : i32
    return %arg0, %c0_i32 : i32, i32
  }
  func.func @transform_1(%arg0: i32) -> (i32, i32) {
    %c0_i32 = arith.constant 0 : i32
    %c0_i32_0 = arith.constant 0 : i32
    return %arg0, %c0_i32 : i32, i32
  }
}

</mosaic_0001>

<bundles_post_ra>
// kernel: custom-call.1
= control target key start
LH: loop header
LB: loop body
LE: loop exit
PB: predicated region body
PF: predicated region fallthrough
CT: control target
= control target key end

     0   :  { %s59_s0 = inlined_call_operand.hbm [shape: c64[2,4,16,16], index: 0, kind: input, shape index: {}]   ;;  %s60_s1 = inlined_call_operand.vmem [shape: f32[2,4,16,16], index: 1, kind: output, shape index: {}]  }
   0x1   :  { %s2_s8 = scalar_lea.hbm %s59_s0, 2048 }
   0x2   :  { %3 = vsyncpa [#allocation0], 0  ;;  %s4_s11 = sshll.u32 %s60_s1, 4  ;;  %s34_s14 = scalar_lea.hbm %s59_s0, 4096  ;;  %s5_s11 = int_to_ptr.vmem [resolvable:$true] %s4_s11 }
   0x3   :  { %p11_p0 = scmp.ne.s32.totalorder %s2_s8, %s34_s14  ;;  %p13_p1 = scmp.lt.u32.totalorder %s2_s8, %s59_s0 }
   0x4   :  { %p14_p2 = scmp.lt.u32.totalorder %s34_s14, %s34_s14  ;;  %p16_p4 = scmp.lt.u32.totalorder %s34_s14, %s2_s8 }
   0x6   :  { %p15_p3 = por %p14_p2, %p13_p1 }
   0x8   :  { %p17_p5 = por %p16_p4, %p15_p3 }
   0xa   :  { %p18_p6 = pnand %p17_p5, %p11_p0 }
   0xc   :  { %21 = shalt.err (!%p18_p6)  }
   0xd   :  { %s22_s17 = scalar_lea.vmem %s5_s11, 2048  ;;  %p27_p8 = scmp.lt.s32.totalorder %s5_s11, %s5_s11 }
   0xe   :  { %p23_p7 = scmp.ne.s32.totalorder %s5_s11, %s22_s17  ;;  %p28_p9 = scmp.lt.s32.totalorder %s22_s17, %s22_s17 }
  0x10   :  { %p29_p10 = por %p28_p9, %p27_p8 }
  0x12   :  { %p30_p11 = pnand %p29_p10, %p23_p7 }
  0x14   :  { %33 = shalt.err (!%p30_p11)  }
  0x15   :  { %7 = dma.hbm_to_vmem [thread:$0]  %s2_s8, 2048, %s5_s11, [#allocation0] }
  0x16   :  { %35 = dma.done.wait [#allocation0], 2048  }
  0x17   :  { %36 = vsyncadd [#allocation0], 4294965248 }
  0x18   :  { %9 = vsyncpa [#allocation0], 1 }

// kernel: custom-call
= control target key start
LH: loop header
LB: loop body
LE: loop exit
PB: predicated region body
PF: predicated region fallthrough
CT: control target
= control target key end

     0   :  { %2 = vsyncpa [#allocation0], 0  ;;  %s61_s0 = inlined_call_operand.hbm [shape: c64[2,4,16,16], index: 0, kind: input, shape index: {}]   ;;  %s62_s1 = inlined_call_operand.vmem [shape: f32[2,4,16,16], index: 1, kind: output, shape index: {}]  }
   0x1   :  { %s3_s8 = sshll.u32 %s62_s1, 4  ;;  %s9_s11 = scalar_lea.hbm %s61_s0, 2048  ;;  %s4_s8 = int_to_ptr.vmem [resolvable:$true] %s3_s8 }
   0x2   :  { %p10_p0 = scmp.ne.s32.totalorder %s61_s0, %s9_s11  ;;  %s11_s16 = scalar_lea.hbm %s61_s0, 4096 }
   0x3   :  { %p12_p1 = scmp.lt.u32.totalorder %s11_s16, %s9_s11  ;;  %p13_p2 = scmp.lt.u32.totalorder %s9_s11, %s61_s0 }
   0x5   :  { %p14_p3 = por %p13_p2, %p12_p1 }
   0x7   :  { %p15_p4 = pnand %p14_p3, %p10_p0 }
   0x9   :  { %18 = shalt.err (!%p15_p4)  }
   0xa   :  { %s19_s1 = scalar_lea.vmem %s4_s8, 2048  ;;  %p24_p6 = scmp.lt.s32.totalorder %s4_s8, %s4_s8 }
   0xb   :  { %p20_p5 = scmp.ne.s32.totalorder %s4_s8, %s19_s1  ;;  %p25_p7 = scmp.lt.s32.totalorder %s19_s1, %s19_s1 }
   0xd   :  { %p26_p8 = por %p25_p7, %p24_p6 }
   0xf   :  { %p27_p9 = pnand %p26_p8, %p20_p5 }
  0x11   :  { %30 = shalt.err (!%p27_p9)  }
  0x12   :  { %6 = dma.hbm_to_vmem [thread:$0]  %s61_s0, 2048, %s4_s8, [#allocation0] }
  0x13   :  { %31 = dma.done.wait [#allocation0], 2048  }
  0x14   :  { %32 = vsyncadd [#allocation0], 4294965248 }
  0x15   :  { %8 = vsyncpa [#allocation0], 1 }

// kernel: _complex_relu_impl.1
= control target key start
LH: loop header
LB: loop body
LE: loop exit
PB: predicated region body
PF: predicated region fallthrough
CT: control target
= control target key end

     0   :  { %s196_s6 = smov 0   ;;  %s216_s0 = inlined_call_operand.vmem [shape: f32[32,128], index: 0, kind: input, shape index: {}, may-alias: {0,1}]   ;;  %s217_s1 = inlined_call_operand.vmem [shape: f32[32,128], index: 1, kind: output, shape index: {}, may-alias: {0,1}]  }
   0x1 LB: > { %s175_s7 = sadd.s32 4294967295, %s198_s6   ;;  %p179_p0 = scmp.ge.s32.totalorder %s198_s6, 1  ;;  %s198_s6 = sphi %s196_s6, %s11_s6  }
   0x2   : > { %p86_p1 = scmp.lt.s32.totalorder %s198_s6, 5 }
   0x4   : > { %p87_p2 = pnand %p179_p0, %p86_p1 }
   0x5   : > { %p104_p3 = scmp.lt.s32.totalorder (!%p87_p2), %s175_s7, 3  ;;  %v113_v0 = vlaneseq (!%p87_p2) }
   0x6   : > { %90 = sbr.rel (%p87_p2) target bundleno = 22 (0x16), region = 24 }
   0x7   : > { %v114_v1 = vand.u32 (!%p87_p2), 127, %v113_v0 }
   0x9   : > { %v115_v2 = vand.u32 (!%p87_p2), 1, %v114_v1 }
   0xb   : > { %vm116_vm0 = vcmp.eq.s32.totalorder (!%p87_p2), %v115_v2, 0 }
   0xd   : > { %s219_s7 = smov (!%p104_p3, %s175_s7), 3 }
   0xe   : > { %s180_s8 = sshll.u32 %s219_s7, 3 }
   0xf   : > { %s107_s11 = scalar_lea.vmem %s216_s0, %s180_s8  ;;  %s111_s14 = scalar_lea.vmem %s217_s1, %s180_s8 }
  0x10   : > { %v112_v3 = vld [vmem:[%s107_s11] sm:$0xff] }
  0x11   : > { %vm117_vm1 = vcmp.ge.f32.partialorder %v112_v3, 0.0  ;;  %v118_v4 = vmul.f32 0.0, %v112_v3 }
  0x13   : > { %v119_v5 = vsel %vm117_vm1, %v112_v3, %v118_v4 }
  0x14   : > { %v120_v6 = vsel %vm116_vm0, %v119_v5, %v112_v3 }
  0x15   : > { %121 = vst [vmem:[%s111_s14] sm:$0xff] %v120_v6 }
  0x16 PF: > { %s11_s6 = sadd.s32 1, %s198_s6  }
  0x17   : > { %p8_p4 = scmp.ge.s32.totalorder %s11_s6, 6  }
  0x19   :  { %10 = sbr.rel (!%p8_p4) target bundleno = 1 (0x1), region = 54 }

// kernel: custom-call.2
= control target key start
LH: loop header
LB: loop body
LE: loop exit
PB: predicated region body
PF: predicated region fallthrough
CT: control target
= control target key end

     0   :  { %s126_s0 = inlined_call_operand.vmem [shape: f32[2,4,16,16], index: 0, kind: input, shape index: {}]   ;;  %s127_s1 = inlined_call_operand.vmem [shape: f32[2,4,16,16], index: 1, kind: input, shape index: {}]   ;;  %s128_s2 = inlined_call_operand.hbm [shape: c64[2,4,16,16], index: 2, kind: output, shape index: {}]  }
   0x1   :  { %s87_s11 = scalar_lea.hbm %s128_s2, 2048 }
   0x2   :  { %4 = vsyncpa [#allocation0], 0  ;;  %s5_s14 = sshll.u32 %s126_s0, 4  ;;  %s6_s14 = int_to_ptr.vmem [resolvable:$true] %s5_s14 }
   0x3   :  { %s18_s15 = scalar_lea.vmem %s6_s14, 2048  ;;  %p23_p1 = scmp.lt.s32.totalorder %s6_s14, %s6_s14 }
   0x4   :  { %p19_p0 = scmp.ne.s32.totalorder %s6_s14, %s18_s15  ;;  %p24_p2 = scmp.lt.s32.totalorder %s18_s15, %s18_s15 }
   0x6   :  { %p25_p3 = por %p24_p2, %p23_p1 }
   0x8   :  { %p26_p4 = pnand %p25_p3, %p19_p0 }
   0xa   :  { %29 = shalt.err (!%p26_p4)  }
   0xb   :  { %p31_p5 = scmp.ne.s32.totalorder %s128_s2, %s87_s11  ;;  %s32_s0 = scalar_lea.hbm %s128_s2, 4096 }
   0xc   :  { %p33_p6 = scmp.lt.u32.totalorder %s32_s0, %s87_s11  ;;  %p34_p7 = scmp.lt.u32.totalorder %s87_s11, %s128_s2 }
   0xe   :  { %p35_p8 = por %p34_p7, %p33_p6 }
  0x10   :  { %p36_p9 = pnand %p35_p8, %p31_p5 }
  0x12   :  { %39 = shalt.err (!%p36_p9)  }
  0x13   :  { %8 = dma.vmem_to_hbm [thread:$0]  %s6_s14, 2048, %s128_s2, [#allocation0] }
  0x14   :  { %65 = dma.done.wait [#allocation0], 2048  }
  0x15   :  { %66 = vsyncadd [#allocation0], 4294965248 }
  0x16   :  { %10 = vsyncpa [#allocation0], 1 }
  0x17   :  { %11 = vsyncpa [#allocation1], 0  ;;  %s12_s28 = sshll.u32 %s127_s1, 4  ;;  %s13_s28 = int_to_ptr.vmem [resolvable:$true] %s12_s28 }
  0x18   :  { %s40_s29 = scalar_lea.vmem %s13_s28, 2048  ;;  %p45_p11 = scmp.lt.s32.totalorder %s13_s28, %s13_s28 }
  0x19   :  { %p41_p10 = scmp.ne.s32.totalorder %s13_s28, %s40_s29  ;;  %p46_p12 = scmp.lt.s32.totalorder %s40_s29, %s40_s29 }
  0x1b   :  { %p47_p13 = por %p46_p12, %p45_p11 }
  0x1d   :  { %p48_p0 = pnand %p47_p13, %p41_p10 }
  0x1f   :  { %51 = shalt.err (!%p48_p0)  }
  0x20   :  { %p53_p1 = scmp.ne.s32.totalorder %s87_s11, %s32_s0  ;;  %p56_p2 = scmp.lt.u32.totalorder %s32_s0, %s32_s0 }
  0x22   :  { %p57_p3 = por %p56_p2, %p34_p7 }
  0x24   :  { %p59_p4 = por %p57_p3, %p33_p6 }
  0x26   :  { %p60_p5 = pnand %p59_p4, %p53_p1 }
  0x28   :  { %63 = shalt.err (!%p60_p5)  }
  0x29   :  { %15 = dma.vmem_to_hbm [thread:$0]  %s13_s28, 2048, %s87_s11, [#allocation1] }
  0x2a   :  { %67 = dma.done.wait [#allocation1], 2048  }
  0x2b   :  { %68 = vsyncadd [#allocation1], 4294965248 }
  0x2c   :  { %17 = vsyncpa [#allocation1], 1 }

</bundles_post_ra>
